<compile_context>
chip_gen: v5e
topology: v5e:2x2
jax: 0.10.0
libtpu: 0.0.40
codegen_flags: <defaults>
</compile_context>

<pallas_src>
import jax
import jax.numpy as jnp
from jax.experimental import pallas as pl
from jax.experimental.pallas import tpu as pltpu

NEG_SLOPE = 0.01  # F.leaky_relu default negative_slope
LANE = 128        # TPU lane width


def _round_up(x, m):
    return ((x + m - 1) // m) * m


def _leaky_relu(x):
    return jnp.where(x > 0, x, NEG_SLOPE * x)


def qnetwork_kernel(x_ref, w1_ref, b1_ref, w2_ref, b2_ref, w3_ref, b3_ref, o_ref):
    # x_ref: (TB, S) bf16 activation tile; weights bf16 (in, out); biases f32 (1, out).
    # Three MXU matmuls with f32 accumulation; all elementwise math stays f32.
    x = x_ref[...]

    h1 = jnp.dot(x, w1_ref[...], preferred_element_type=jnp.float32) + b1_ref[...]
    h1 = _leaky_relu(h1)                       # f32 VPU math

    h2 = jnp.dot(h1.astype(jnp.bfloat16), w2_ref[...],
                 preferred_element_type=jnp.float32) + b2_ref[...]
    h2 = _leaky_relu(h2)                       # f32 VPU math

    out = jnp.dot(h2.astype(jnp.bfloat16), w3_ref[...],
                  preferred_element_type=jnp.float32) + b3_ref[...]
    o_ref[...] = out.astype(o_ref.dtype)       # lane-dense (TB, 128) store


def prepare_params(params, action_size):
    """Cast weights to bf16 and pad fc3 to a lane-dense 128-wide output."""
    w3 = params["w3"]
    h2 = w3.shape[0]
    n_pad = _round_up(max(action_size, 1), LANE)

    w3p = jnp.zeros((h2, n_pad), jnp.float32).at[:, :action_size].set(w3)
    b3p = jnp.zeros((1, n_pad), jnp.float32).at[:, :action_size].set(params["b3"])

    return {
        "w1": params["w1"].astype(jnp.bfloat16),
        "b1": params["b1"].astype(jnp.float32),
        "w2": params["w2"].astype(jnp.bfloat16),
        "b2": params["b2"].astype(jnp.float32),
        "w3": w3p.astype(jnp.bfloat16),
        "b3": b3p,
        "action_size": action_size,
    }


def qnetwork_forward(state, prepared, *, block_b=512):
    """state: (B, state_size) f32. prepared: output of prepare_params()."""
    w1, b1 = prepared["w1"], prepared["b1"]
    w2, b2 = prepared["w2"], prepared["b2"]
    w3, b3 = prepared["w3"], prepared["b3"]
    action_size = prepared["action_size"]

    B, S = state.shape
    H1 = w1.shape[1]
    H2 = w2.shape[1]
    NP = w3.shape[1]           # lane-padded output width (multiple of 128)

    # Pick a batch tile: multiple of 8 (sublane), capped at block_b, then pad
    # the batch so the grid divides evenly.
    tb = min(block_b, _round_up(B, 8))
    Bp = _round_up(B, tb)
    x = state.astype(jnp.bfloat16)
    if Bp != B:
        x = jnp.pad(x, ((0, Bp - B), (0, 0)))
    n_blocks = Bp // tb

    flops = 2 * Bp * (S * H1 + H1 * H2 + H2 * NP)
    bytes_accessed = (
        Bp * S * 2                                   # activations in (bf16)
        + (S * H1 + H1 * H2 + H2 * NP) * 2           # weights (bf16)
        + (H1 + H2 + NP) * 4                         # biases (f32)
        + Bp * NP * 4                                # output (f32)
    )

    out = pl.pallas_call(
        qnetwork_kernel,
        out_shape=jax.ShapeDtypeStruct((Bp, NP), jnp.float32),
        grid=(n_blocks,),
        in_specs=[
            pl.BlockSpec((tb, S), lambda i: (i, 0)),   # activation tile (pipelined)
            pl.BlockSpec((S, H1), lambda i: (0, 0)),   # weights: resident across grid
            pl.BlockSpec((1, H1), lambda i: (0, 0)),
            pl.BlockSpec((H1, H2), lambda i: (0, 0)),
            pl.BlockSpec((1, H2), lambda i: (0, 0)),
            pl.BlockSpec((H2, NP), lambda i: (0, 0)),
            pl.BlockSpec((1, NP), lambda i: (0, 0)),
        ],
        out_specs=pl.BlockSpec((tb, NP), lambda i: (i, 0)),
        compiler_params=pltpu.CompilerParams(
            dimension_semantics=("parallel",),         # shard batch across TCs (v7x)
        ),
        cost_estimate=pl.CostEstimate(
            flops=flops, transcendentals=0, bytes_accessed=bytes_accessed),
    )(x, w1, b1, w2, b2, w3, b3)

    return out[:B, :action_size]


def init_params(key, state_size, action_size, fc1_units=128, fc2_units=128):
    """Deterministic synthetic init (Kaiming-uniform-ish like nn.Linear default)."""
    def linear_init(k, fan_in, fan_out):
        kw, kb = jax.random.split(k)
        bound = 1.0 / jnp.sqrt(fan_in)
        # stored as (in, out) — i.e. PyTorch weight.T — so kernel does x @ W + b
        w = jax.random.uniform(kw, (fan_in, fan_out), jnp.float32, -bound, bound)
        b = jax.random.uniform(kb, (1, fan_out), jnp.float32, -bound, bound)
        return w, b

    k1, k2, k3 = jax.random.split(key, 3)
    w1, b1 = linear_init(k1, state_size, fc1_units)
    w2, b2 = linear_init(k2, fc1_units, fc2_units)
    w3, b3 = linear_init(k3, fc2_units, action_size)
    return {"w1": w1, "b1": b1, "w2": w2, "b2": b2, "w3": w3, "b3": b3}


def reference_forward(state, params):
    """Pure-JAX reference mirroring the kernel's bf16-storage / f32-accumulate numerics."""
    bf, f32 = jnp.bfloat16, jnp.float32
    x = state.astype(bf)
    h1 = _leaky_relu(jnp.dot(x, params["w1"].astype(bf),
                             preferred_element_type=f32) + params["b1"])
    h2 = _leaky_relu(jnp.dot(h1.astype(bf), params["w2"].astype(bf),
                             preferred_element_type=f32) + params["b2"])
    return jnp.dot(h2.astype(bf), params["w3"].astype(bf),
                   preferred_element_type=f32) + params["b3"]


if __name__ == "__main__":
    # 2048 board: state_size = 16 (flattened 4x4 board), action_size = 4 moves.
    batch, state_size, action_size = 8, 16, 4

    key = jax.random.PRNGKey(0)
    k_params, k_state, k_big = jax.random.split(key, 3)
    params = init_params(k_params, state_size, action_size)
    prepared = prepare_params(params, action_size)

    # Small (online-inference) batch.
    state = jax.random.normal(k_state, (batch, state_size), jnp.float32)
    out = jax.block_until_ready(qnetwork_forward(state, prepared))
    ref = reference_forward(state, params)
    assert out.shape == (batch, action_size)
    assert jnp.allclose(out, ref, atol=2e-2, rtol=2e-2), "mismatch vs reference (small batch)"

    # Replay-buffer-sized batch: exercises the tiled grid + parallel semantics.
    big_state = jax.random.normal(k_big, (1024, state_size), jnp.float32)
    big_out = jax.block_until_ready(qnetwork_forward(big_state, prepared, block_b=256))
    big_ref = reference_forward(big_state, params)
    assert big_out.shape == (1024, action_size)
    assert jnp.allclose(big_out, big_ref, atol=2e-2, rtol=2e-2), "mismatch vs reference (big batch)"

    print("KERNEL_OK")
</pallas_src>

<mosaic_0001>
module attributes {stable_mosaic.version = 11 : i64} {
  func.func @qnetwork_kernel(%arg0: i32, %arg1: memref<8x16xbf16, #tpu.memory_space<vmem>>, %arg2: memref<16x128xbf16, #tpu.memory_space<vmem>>, %arg3: memref<1x128xf32, #tpu.memory_space<vmem>>, %arg4: memref<128x128xbf16, #tpu.memory_space<vmem>>, %arg5: memref<1x128xf32, #tpu.memory_space<vmem>>, %arg6: memref<128x128xbf16, #tpu.memory_space<vmem>>, %arg7: memref<1x128xf32, #tpu.memory_space<vmem>>, %arg8: memref<8x128xf32, #tpu.memory_space<vmem>>) attributes {dimension_semantics = [#tpu.dimension_semantics<parallel>], iteration_bounds = array<i64: 1>, scalar_prefetch = 0 : i64, scratch_operands = 0 : i64, tpu.core_type = #tpu.core_type<tc>, window_params = [{transform_indices = @transform_0, window_bounds = array<i64: 8, 16>}, {pipeline_mode = #tpu.pipeline_mode<synchronous>, transform_indices = @transform_1, window_bounds = array<i64: 16, 128>}, {pipeline_mode = #tpu.pipeline_mode<synchronous>, transform_indices = @transform_2, window_bounds = array<i64: 1, 128>}, {pipeline_mode = #tpu.pipeline_mode<synchronous>, transform_indices = @transform_3, window_bounds = array<i64: 128, 128>}, {pipeline_mode = #tpu.pipeline_mode<synchronous>, transform_indices = @transform_4, window_bounds = array<i64: 1, 128>}, {pipeline_mode = #tpu.pipeline_mode<synchronous>, transform_indices = @transform_5, window_bounds = array<i64: 128, 128>}, {pipeline_mode = #tpu.pipeline_mode<synchronous>, transform_indices = @transform_6, window_bounds = array<i64: 1, 128>}, {transform_indices = @transform_7, window_bounds = array<i64: 8, 128>}]} {
    %c0 = arith.constant 0 : index
    %c0_0 = arith.constant 0 : index
    %0 = vector.load %arg1[%c0, %c0_0] : memref<8x16xbf16, #tpu.memory_space<vmem>>, vector<8x16xbf16>
    %c0_1 = arith.constant 0 : index
    %c0_2 = arith.constant 0 : index
    %1 = vector.load %arg2[%c0_1, %c0_2] : memref<16x128xbf16, #tpu.memory_space<vmem>>, vector<16x128xbf16>
    %cst = arith.constant dense<0.000000e+00> : vector<8x128xf32>
    %2 = tpu.matmul %0, %1, %cst {dimension_numbers = #tpu.dot_dimension_numbers<[1], [0], [0], [1], [0, 0, 1, 1], [], []>} : vector<8x16xbf16>, vector<16x128xbf16>, vector<8x128xf32> -> vector<8x128xf32>
    %c0_3 = arith.constant 0 : index
    %c0_4 = arith.constant 0 : index
    %3 = vector.load %arg3[%c0_3, %c0_4] : memref<1x128xf32, #tpu.memory_space<vmem>>, vector<1x128xf32>
    %4 = vector.broadcast %3 : vector<1x128xf32> to vector<8x128xf32>
    %5 = arith.addf %2, %4 : vector<8x128xf32>
    %cst_5 = arith.constant 0.000000e+00 : f32
    %6 = vector.broadcast %cst_5 : f32 to vector<8x128xf32>
    %7 = arith.cmpf ogt, %5, %6 : vector<8x128xf32>
    %cst_6 = arith.constant 0.00999999977 : f32
    %8 = vector.broadcast %cst_6 : f32 to vector<8x128xf32>
    %9 = arith.mulf %8, %5 : vector<8x128xf32>
    %10 = arith.select %7, %5, %9 : vector<8x128xi1>, vector<8x128xf32>
    %11 = arith.truncf %10 : vector<8x128xf32> to vector<8x128xbf16>
    %c0_7 = arith.constant 0 : index
    %c0_8 = arith.constant 0 : index
    %12 = vector.load %arg4[%c0_7, %c0_8] : memref<128x128xbf16, #tpu.memory_space<vmem>>, vector<128x128xbf16>
    %cst_9 = arith.constant dense<0.000000e+00> : vector<8x128xf32>
    %13 = tpu.matmul %11, %12, %cst_9 {dimension_numbers = #tpu.dot_dimension_numbers<[1], [0], [0], [1], [0, 0, 1, 1], [], []>} : vector<8x128xbf16>, vector<128x128xbf16>, vector<8x128xf32> -> vector<8x128xf32>
    %c0_10 = arith.constant 0 : index
    %c0_11 = arith.constant 0 : index
    %14 = vector.load %arg5[%c0_10, %c0_11] : memref<1x128xf32, #tpu.memory_space<vmem>>, vector<1x128xf32>
    %15 = vector.broadcast %14 : vector<1x128xf32> to vector<8x128xf32>
    %16 = arith.addf %13, %15 : vector<8x128xf32>
    %cst_12 = arith.constant 0.000000e+00 : f32
    %17 = vector.broadcast %cst_12 : f32 to vector<8x128xf32>
    %18 = arith.cmpf ogt, %16, %17 : vector<8x128xf32>
    %cst_13 = arith.constant 0.00999999977 : f32
    %19 = vector.broadcast %cst_13 : f32 to vector<8x128xf32>
    %20 = arith.mulf %19, %16 : vector<8x128xf32>
    %21 = arith.select %18, %16, %20 : vector<8x128xi1>, vector<8x128xf32>
    %22 = arith.truncf %21 : vector<8x128xf32> to vector<8x128xbf16>
    %c0_14 = arith.constant 0 : index
    %c0_15 = arith.constant 0 : index
    %23 = vector.load %arg6[%c0_14, %c0_15] : memref<128x128xbf16, #tpu.memory_space<vmem>>, vector<128x128xbf16>
    %cst_16 = arith.constant dense<0.000000e+00> : vector<8x128xf32>
    %24 = tpu.matmul %22, %23, %cst_16 {dimension_numbers = #tpu.dot_dimension_numbers<[1], [0], [0], [1], [0, 0, 1, 1], [], []>} : vector<8x128xbf16>, vector<128x128xbf16>, vector<8x128xf32> -> vector<8x128xf32>
    %c0_17 = arith.constant 0 : index
    %c0_18 = arith.constant 0 : index
    %25 = vector.load %arg7[%c0_17, %c0_18] : memref<1x128xf32, #tpu.memory_space<vmem>>, vector<1x128xf32>
    %26 = vector.broadcast %25 : vector<1x128xf32> to vector<8x128xf32>
    %27 = arith.addf %24, %26 : vector<8x128xf32>
    %c0_19 = arith.constant 0 : index
    %c0_20 = arith.constant 0 : index
    %28 = vector.load %arg8[%c0_19, %c0_20] : memref<8x128xf32, #tpu.memory_space<vmem>>, vector<8x128xf32>
    tpu.vector_store %arg8[%c0_19, %c0_20], %27 {strides = array<i32>} : memref<8x128xf32, #tpu.memory_space<vmem>>, vector<8x128xf32>,
    return
  }
  func.func @transform_0(%arg0: i32) -> (i32, i32) {
    %c0_i32 = arith.constant 0 : i32
    %c0_i32_0 = arith.constant 0 : i32
    return %arg0, %c0_i32 : i32, i32
  }
  func.func @transform_1(%arg0: i32) -> (i32, i32) {
    %c0_i32 = arith.constant 0 : i32
    %c0_i32_0 = arith.constant 0 : i32
    %c0_i32_1 = arith.constant 0 : i32
    return %c0_i32, %c0_i32_0 : i32, i32
  }
  func.func @transform_2(%arg0: i32) -> (i32, i32) {
    %c0_i32 = arith.constant 0 : i32
    %c0_i32_0 = arith.constant 0 : i32
    %c0_i32_1 = arith.constant 0 : i32
    return %c0_i32, %c0_i32_0 : i32, i32
  }
  func.func @transform_3(%arg0: i32) -> (i32, i32) {
    %c0_i32 = arith.constant 0 : i32
    %c0_i32_0 = arith.constant 0 : i32
    %c0_i32_1 = arith.constant 0 : i32
    return %c0_i32, %c0_i32_0 : i32, i32
  }
  func.func @transform_4(%arg0: i32) -> (i32, i32) {
    %c0_i32 = arith.constant 0 : i32
    %c0_i32_0 = arith.constant 0 : i32
    %c0_i32_1 = arith.constant 0 : i32
    return %c0_i32, %c0_i32_0 : i32, i32
  }
  func.func @transform_5(%arg0: i32) -> (i32, i32) {
    %c0_i32 = arith.constant 0 : i32
    %c0_i32_0 = arith.constant 0 : i32
    %c0_i32_1 = arith.constant 0 : i32
    return %c0_i32, %c0_i32_0 : i32, i32
  }
  func.func @transform_6(%arg0: i32) -> (i32, i32) {
    %c0_i32 = arith.constant 0 : i32
    %c0_i32_0 = arith.constant 0 : i32
    %c0_i32_1 = arith.constant 0 : i32
    return %c0_i32, %c0_i32_0 : i32, i32
  }
  func.func @transform_7(%arg0: i32) -> (i32, i32) {
    %c0_i32 = arith.constant 0 : i32
    %c0_i32_0 = arith.constant 0 : i32
    return %arg0, %c0_i32 : i32, i32
  }
}

</mosaic_0001>

<bundles_post_ra>
// kernel: tpu_custom_call.1
= control target key start
LH: loop header
LB: loop body
LE: loop exit
PB: predicated region body
PF: predicated region fallthrough
CT: control target
= control target key end

     0   :  { %12 = vsyncpa [#allocation3], 0  ;;  %s604_s0 = inlined_call_operand.hbm [shape: bf16[8,16], index: 0, kind: input, shape index: {}]   ;;  %s605_s1 = inlined_call_operand.hbm [shape: bf16[16,128], index: 1, kind: input, shape index: {}]   ;;  %s606_s2 = inlined_call_operand.vmem [shape: f32[1,128], index: 2, kind: input, shape index: {}]   ;;  %s607_s3 = inlined_call_operand.hbm [shape: bf16[128,128], index: 3, kind: input, shape index: {}]   ;;  %s608_s4 = inlined_call_operand.vmem [shape: f32[1,128], index: 4, kind: input, shape index: {}]   ;;  %s609_s5 = inlined_call_operand.hbm [shape: bf16[128,128], index: 5, kind: input, shape index: {}]   ;;  %s610_s6 = inlined_call_operand.vmem [shape: f32[1,128], index: 6, kind: input, shape index: {}]   ;;  %s611_s7 = inlined_call_operand.hbm [shape: f32[8,128], index: 7, kind: output, shape index: {}]  }
   0x1   :  { %13 = vsyncpa [#allocation6], 0 }
   0x2   :  { %14 = vsyncpa [#allocation9], 0  ;;  %s31_s26 = sshll.u32 %s605_s1, 4  ;;  %s32_s26 = int_to_ptr.hbm [resolvable:$true] %s31_s26 }
   0x3   :  { %15 = vsyncpa [#allocation4], 0  ;;  %s533_s27 = smov [#allocation5]   ;;  %s21_s8 = sshll.u32 %s604_s0, 4  ;;  %s22_s8 = int_to_ptr.hbm [resolvable:$true] %s21_s8 }
   0x4   :  { %s33_s28 = sshll.u32 %s533_s27, 4  ;;  %s534_s9 = smov 64   ;;  %s34_s28 = int_to_ptr.vmem [resolvable:$true] %s33_s28 }
   0x5   :  { %s535_s10 = smov 4   ;;  %s536_s11 = smov [#allocation2]  }
   0x6   :  { %39 = dma.hbm_to_vmem [thread:$0]  %s32_s26, 128, %s34_s28, [#allocation6], %s534_s9, %s534_s9, %s535_s10  }
   0x7   :  { %s23_s12 = sshll.u32 %s536_s11, 4  ;;  %s46_s15 = sshll.u32 %s607_s3, 4  ;;  %s24_s12 = int_to_ptr.vmem [resolvable:$true] %s23_s12  ;;  %s47_s15 = int_to_ptr.hbm [resolvable:$true] %s46_s15 }
   0x8   :  { %26 = dma.hbm_to_vmem [thread:$0]  %s22_s8, 64, %s24_s12, [#allocation3]  }
   0x9   :  { %s61_s17 = sshll.u32 %s609_s5, 4  ;;  %s537_s18 = smov [#allocation7]   ;;  %s62_s17 = int_to_ptr.hbm [resolvable:$true] %s61_s17 }
   0xa   :  { %s48_s19 = sshll.u32 %s537_s18, 4  ;;  %s538_s0 = smov [#allocation8]   ;;  %s49_s19 = int_to_ptr.vmem [resolvable:$true] %s48_s19 }
   0xb   :  { %54 = dma.hbm_to_vmem [thread:$0]  %s47_s15, 1024, %s49_s19, [#allocation6], %s534_s9, %s534_s9, %s535_s10  }
   0xc   :  { %s63_s20 = sshll.u32 %s538_s0, 4  ;;  %s64_s20 = int_to_ptr.vmem [resolvable:$true] %s63_s20 }
   0xd   :  { %69 = dma.hbm_to_vmem [thread:$0]  %s62_s17, 1024, %s64_s20, [#allocation9], %s534_s9, %s534_s9, %s535_s10  }
   0xe   :  { %525 = dma.done.wait [#allocation3], 64  }
   0xf   :  { %526 = vsyncadd [#allocation3], 4294967232 }
  0x10   :  { %527 = dma.done.wait [#allocation6], 1152  }
  0x11   :  { %528 = vsyncadd [#allocation6], 4294966144 }
  0x12   :  { %529 = dma.done.wait [#allocation9], 1024  }
  0x13   :  { %530 = vsyncadd [#allocation9], 4294966272  ;;  %v378_v0 = vld [vmem:[#allocation5] sm:$0xff]  ;;  %v89_v2 = vld [vmem:[#allocation2] sm:$0xf]  ;;  %vm102_vm0 = vcmask 130048  }
  0x14   :  { %v386_v1 = vld [vmem:[#allocation7 + $0x38] sm:$0xff]  ;;  %113 = vmatpush.bf16.msra.mxu0 %v378_v0  ;;  %v385_v3 = vld [vmem:[#allocation7 + $0x30] sm:$0xff]  ;;  %v384_v4 = vld [vmem:[#allocation7 + $0x28] sm:$0xff]  ;;  %s539_s24 = smov [#allocation10]   ;;  %s297_s28 = sshll.u32 %s611_s7, 4  ;;  %s298_s28 = int_to_ptr.hbm [resolvable:$true] %s297_s28 }
  0x15   :  { %191 = vmatpush.bf16.msra.mxu1 %v386_v1  ;;  %v383_v5 = vld [vmem:[#allocation7 + $0x20] sm:$0xff]  ;;  %v382_v6 = vld [vmem:[#allocation7 + $0x18] sm:$0xff]  ;;  %v381_v7 = vld [vmem:[#allocation7 + $0x10] sm:$0xff]  ;;  %s295_s25 = sshll.u32 %s539_s24, 4  ;;  %s296_s25 = int_to_ptr.vmem [resolvable:$true] %s295_s25 }
  0x16   :  { %v380_v8 = vld [vmem:[#allocation7 + $0x8] sm:$0xff]  ;;  %v379_v9 = vld [vmem:[#allocation7] sm:$0xff]  ;;  %v394_v10 = vld [vmem:[#allocation8 + $0x38] sm:$0xff] }
  0x17   :  { %313 = vmatmul.msk.bf16.vlgmr.msra.gmra.mxu0 %vm102_vm0, %v89_v2  ;;  %276 = vmatpush.bf16.msra.mxu2 %v394_v10  ;;  %v393_v11 = vld [vmem:[#allocation8 + $0x30] sm:$0xff]  ;;  %v392_v12 = vld [vmem:[#allocation8 + $0x28] sm:$0xff]  ;;  %v391_v13 = vld [vmem:[#allocation8 + $0x20] sm:$0xff] }
  0x18   :  { %v390_v14 = vld [vmem:[#allocation8 + $0x18] sm:$0xff]  ;;  %v389_v15 = vld [vmem:[#allocation8 + $0x10] sm:$0xff]  ;;  %v388_v23 = vld [vmem:[#allocation8 + $0x8] sm:$0xff] }
  0x19   :  { %192 = vmatpush.bf16.msra.mxu1 %v385_v3  ;;  %v402_v16 = vld [vmem:[%s606_s2] ss:$0 sm:$0xff]  ;;  %v387_v24 = vld [vmem:[#allocation8] sm:$0xff] }
  0x1a   :  { %v403_v25 = vld [vmem:[%s608_s4] ss:$0 sm:$0xff] }
  0x1b   :  { %277 = vmatpush.bf16.msra.mxu2 %v393_v11  ;;  %v404_v32 = vld [vmem:[%s610_s6] ss:$0 sm:$0xff] }
  0x1d   :  { %193 = vmatpush.bf16.msra.mxu1 %v384_v4 }
  0x1f   :  { %278 = vmatpush.bf16.msra.mxu2 %v392_v12 }
  0x21   :  { %194 = vmatpush.bf16.msra.mxu1 %v383_v5 }
  0x23   :  { %279 = vmatpush.bf16.msra.mxu2 %v391_v13 }
  0x25   :  { %195 = vmatpush.bf16.msra.mxu1 %v382_v6 }
  0x27   :  { %280 = vmatpush.bf16.msra.mxu2 %v390_v14 }
  0x29   :  { %196 = vmatpush.bf16.msra.mxu1 %v381_v7 }
  0x2b   :  { %281 = vmatpush.bf16.msra.mxu2 %v389_v15 }
  0x2d   :  { %197 = vmatpush.bf16.msra.mxu1 %v380_v8 }
  0x2f   :  { %282 = vmatpush.bf16.msra.mxu2 %v388_v23 }
  0x31   :  { %198 = vmatpush.bf16.msra.mxu1 %v379_v9 }
  0x33   :  { %283 = vmatpush.bf16.msra.mxu2 %v387_v24 }
  0x94   :  { %v115_v17 = vpop.f32.mrf.mxu0 }
  0x95   :  { %v116_v18 = vadd.f32 %v402_v16, %v115_v17 }
  0x97   :  { %v120_v19 = vmul.f32 0.01, %v116_v18  ;;  %vm119_vm1 = vcmp.gt.f32.partialorder %v116_v18, 0.0 }
  0x99   :  { %v121_v20 = vsel %vm119_vm1, %v116_v18, %v120_v19 }
  0x9a   :  { %v122_v21 = vpack.c.bf16 %v121_v20, %v121_v20 }
  0x9c   :  { %v117_v22 = vpop.f32.mrf.mxu0  ;;  %199 = vmatmul.bf16.vlgmr.msra.gmra.mxu1 %v122_v21 }
 0x119   :  { %v200_v26 = vpop.f32.mrf.mxu1 }
 0x11a   :  { %v201_v27 = vadd.f32 %v403_v25, %v200_v26 }
 0x11c   :  { %v205_v28 = vmul.f32 0.01, %v201_v27  ;;  %vm204_vm2 = vcmp.gt.f32.partialorder %v201_v27, 0.0 }
 0x11e   :  { %v206_v29 = vsel %vm204_vm2, %v201_v27, %v205_v28 }
 0x11f   :  { %v207_v30 = vpack.c.bf16 %v206_v29, %v206_v29 }
 0x121   :  { %v202_v31 = vpop.f32.mrf.mxu1  ;;  %284 = vmatmul.bf16.vlgmr.msra.gmra.mxu2 %v207_v30 }
 0x1a4   :  { %v285_v33 = vpop.f32.mrf.mxu2 }
 0x1a5   :  { %v286_v34 = vadd.f32 %v404_v32, %v285_v33 }
 0x1a7   :  { %289 = vst [vmem:[#allocation10] sm:$0xff] %v286_v34 }
 0x1a8   :  { %300 = dma.vmem_to_hbm [thread:$0]  %s296_s25, 128, %s298_s28, [#allocation4]  }
 0x1ac   :  { %v287_v35 = vpop.f32.mrf.mxu2 }
 0x1ad   :  { %531 = dma.done.wait [#allocation4], 128  }
 0x1ae   :  { %532 = vsyncadd [#allocation4], 4294967168 }
 0x1af   :  { %305 = vsyncpa [#allocation3], 1 }
 0x1b0   :  { %306 = vsyncpa [#allocation6], 1 }
 0x1b1   :  { %307 = vsyncpa [#allocation9], 1 }
 0x1b2   :  { %308 = vsyncpa [#allocation4], 1 }

</bundles_post_ra>
